<compile_context>
chip_gen: v7x
topology: tpu7x:2x2x1
jax: 0.10.0
libtpu: 0.0.40
codegen_flags: <defaults>
</compile_context>

<pallas_src>
import functools

import jax
import jax.numpy as jnp
from jax import lax
from jax.experimental import pallas as pl
from jax.experimental.pallas import tpu as pltpu

BN_EPS = 1e-5
NEG_SLOPE = 0.2
DEFAULT_TILE_P = 2048  # pixels per grid step (cap keeps v7x's 64 MiB VMEM happy)


def _leaky_relu(x):
    return jnp.where(x > 0, x, NEG_SLOPE * x)


def _round_up(x, m):
    return ((x + m - 1) // m) * m


def _stats_kernel(x_ref, w1_ref, b1_ref, w2_ref, sum_ref, sumsq_ref,
                  *, tile_p, p_true, masked):
    """Pass 1: conv1 -> LeakyReLU -> conv2; accumulate per-channel sum/sumsq."""
    i = pl.program_id(0)

    @pl.when(i == 0)
    def _():
        sum_ref[...] = jnp.zeros_like(sum_ref)
        sumsq_ref[...] = jnp.zeros_like(sumsq_ref)

    x = x_ref[...]                                               # (cin, tile_p) f32
    h1 = jnp.dot(w1_ref[...], x, preferred_element_type=jnp.float32)
    h1 = _leaky_relu(h1 + b1_ref[...])                           # (ndf, tile_p) f32
    h2 = jnp.dot(w2_ref[...], h1.astype(jnp.bfloat16),
                 preferred_element_type=jnp.float32)             # (ndf2, tile_p) f32

    if masked:  # exclude padded pixel columns from the BN statistics
        lane = lax.broadcasted_iota(jnp.int32, h2.shape, 1)
        valid = (i * tile_p + lane) < p_true
        h2 = jnp.where(valid, h2, 0.0)

    sum_ref[...] += jnp.sum(h2, axis=1, keepdims=True)
    sumsq_ref[...] += jnp.sum(h2 * h2, axis=1, keepdims=True)


def _output_kernel(x_ref, w1_ref, b1_ref, w2_ref, scale_ref, shift_ref,
                   w3_ref, o_ref):
    """Pass 2: recompute conv1/conv2, fused BN affine + LeakyReLU, conv3."""
    x = x_ref[...]                                               # (cin, tile_p) f32
    h1 = jnp.dot(w1_ref[...], x, preferred_element_type=jnp.float32)
    h1 = _leaky_relu(h1 + b1_ref[...])
    h2 = jnp.dot(w2_ref[...], h1.astype(jnp.bfloat16),
                 preferred_element_type=jnp.float32)             # (ndf2, tile_p)
    h2n = _leaky_relu(h2 * scale_ref[...] + shift_ref[...])
    o_ref[...] = jnp.dot(w3_ref[...], h2n.astype(jnp.bfloat16),
                         preferred_element_type=jnp.float32)     # (1, tile_p)


def pixel_discriminator_forward(x_nchw, params, tile_p=DEFAULT_TILE_P):
    """x_nchw: (N, Cin, H, W) f32 -> (N, 1, H, W) f32."""
    w1, b1, w2, gamma, beta, w3 = params
    n, cin, h, w = x_nchw.shape
    ndf = w1.shape[0]
    ndf2 = w2.shape[0]
    p = n * h * w

    # NCHW -> (Cin, P): channels on sublanes, pixels lane-dense.
    x_cp = jnp.transpose(x_nchw, (1, 0, 2, 3)).reshape(cin, p)

    tile_p = min(tile_p, _round_up(p, 128))
    p_pad = _round_up(p, tile_p)
    if p_pad != p:
        x_cp = jnp.pad(x_cp, ((0, 0), (0, p_pad - p)))
    num_tiles = p_pad // tile_p

    # bf16 weights for the MXU-dominant convs; accumulation stays f32.
    w2_bf = w2.astype(jnp.bfloat16)
    w3_bf = w3.astype(jnp.bfloat16)

    const2d = lambda i: (0, 0)
    tile_map = lambda i: (0, i)

    # ---- Pass 1: per-channel sum / sum-of-squares of h2 over all pixels. ----
    # TODO(synk): on v7x (2 TensorCores) split this reduction into per-core
    # partial sums; with a single "arbitrary" axis it runs on one core.
    sums, sumsq = pl.pallas_call(
        functools.partial(_stats_kernel, tile_p=tile_p, p_true=p,
                          masked=(p_pad != p)),
        out_shape=(jax.ShapeDtypeStruct((ndf2, 1), jnp.float32),
                   jax.ShapeDtypeStruct((ndf2, 1), jnp.float32)),
        grid=(num_tiles,),
        in_specs=[
            pl.BlockSpec((cin, tile_p), tile_map),
            pl.BlockSpec((ndf, cin), const2d),
            pl.BlockSpec((ndf, 1), const2d),
            pl.BlockSpec((ndf2, ndf), const2d),
        ],
        out_specs=(pl.BlockSpec((ndf2, 1), const2d),
                   pl.BlockSpec((ndf2, 1), const2d)),
        compiler_params=pltpu.CompilerParams(
            dimension_semantics=("arbitrary",)),
    )(x_cp, w1, b1, w2_bf)

    # BatchNorm (train mode, biased variance) folded into scale/shift (f32).
    mean = sums / p
    var = jnp.maximum(sumsq / p - mean * mean, 0.0)
    rstd = lax.rsqrt(var + BN_EPS)
    scale = gamma * rstd
    shift = beta - mean * scale

    # ---- Pass 2: normalize + LeakyReLU + conv3, lane-dense (1, P) output. ----
    out_1p = pl.pallas_call(
        _output_kernel,
        out_shape=jax.ShapeDtypeStruct((1, p_pad), jnp.float32),
        grid=(num_tiles,),
        in_specs=[
            pl.BlockSpec((cin, tile_p), tile_map),
            pl.BlockSpec((ndf, cin), const2d),
            pl.BlockSpec((ndf, 1), const2d),
            pl.BlockSpec((ndf2, ndf), const2d),
            pl.BlockSpec((ndf2, 1), const2d),
            pl.BlockSpec((ndf2, 1), const2d),
            pl.BlockSpec((1, ndf2), const2d),
        ],
        out_specs=pl.BlockSpec((1, tile_p), tile_map),
        compiler_params=pltpu.CompilerParams(
            dimension_semantics=("parallel",)),
    )(x_cp, w1, b1, w2_bf, scale, shift, w3_bf)

    out = out_1p[:, :p].reshape(1, n, h, w)
    return jnp.transpose(out, (1, 0, 2, 3))


def reference_forward(x_nchw, params):
    """Pure-JAX f32 reference mirroring the PyTorch module (train-mode BN)."""
    w1, b1, w2, gamma, beta, w3 = params
    n, cin, h, w = x_nchw.shape
    x = jnp.transpose(x_nchw, (1, 0, 2, 3)).reshape(cin, -1)      # (cin, P)
    h1 = _leaky_relu(w1 @ x + b1)
    h2 = w2 @ h1
    mean = jnp.mean(h2, axis=1, keepdims=True)
    var = jnp.mean((h2 - mean) ** 2, axis=1, keepdims=True)
    h2n = _leaky_relu((h2 - mean) / jnp.sqrt(var + BN_EPS) * gamma + beta)
    out = w3 @ h2n                                                # (1, P)
    return jnp.transpose(out.reshape(1, n, h, w), (1, 0, 2, 3))


def init_params(key, input_nc=3, ndf=64):
    """Deterministic synthetic params in (out, in) layout like PyTorch conv weights."""
    k1, k2, k3, k4, k5, k6 = jax.random.split(key, 6)
    ndf2 = 2 * ndf
    w1 = jax.random.normal(k1, (ndf, input_nc), jnp.float32) * 0.1
    b1 = jax.random.normal(k2, (ndf, 1), jnp.float32) * 0.1
    w2 = jax.random.normal(k3, (ndf2, ndf), jnp.float32) * 0.1
    gamma = 1.0 + 0.1 * jax.random.normal(k4, (ndf2, 1), jnp.float32)
    beta = 0.1 * jax.random.normal(k5, (ndf2, 1), jnp.float32)
    w3 = jax.random.normal(k6, (1, ndf2), jnp.float32) * 0.1
    return (w1, b1, w2, gamma, beta, w3)


if __name__ == "__main__":
    key = jax.random.PRNGKey(0)
    kx, kp = jax.random.split(key)

    N, C, H, W = 2, 3, 16, 16        # module default input_nc=3, small spatial
    NDF = 64                         # module default ndf

    x = jax.random.normal(kx, (N, C, H, W), jnp.float32)
    params = init_params(kp, input_nc=C, ndf=NDF)

    # tile_p=128 forces a multi-step grid (4 tiles over P=512) so the
    # accumulator / pipelined path is exercised even at this tiny test size;
    # real images use the default 2048-pixel tiles.
    out = pixel_discriminator_forward(x, params, tile_p=128)
    out = jax.block_until_ready(out)

    ref = reference_forward(x, params)
    assert out.shape == (N, 1, H, W), out.shape
    max_err = float(jnp.max(jnp.abs(out - ref)))
    # bf16 MXU inputs for conv2/conv3 -> loosened tolerance vs f32 reference.
    assert jnp.allclose(out, ref, atol=2e-2, rtol=2e-2), max_err

    print("KERNEL_OK")
</pallas_src>

<mosaic_0001>
module attributes {stable_mosaic.version = 11 : i64} {
  func.func @_stats_kernel(%arg0: i32, %arg1: memref<3x128xf32, #tpu.memory_space<vmem>>, %arg2: memref<64x3xf32, #tpu.memory_space<vmem>>, %arg3: memref<64x1xf32, #tpu.memory_space<vmem>>, %arg4: memref<128x64xbf16, #tpu.memory_space<vmem>>, %arg5: memref<128x1xf32, #tpu.memory_space<vmem>>, %arg6: memref<128x1xf32, #tpu.memory_space<vmem>>) attributes {dimension_semantics = [#tpu.dimension_semantics<arbitrary>], iteration_bounds = array<i64: 4>, scalar_prefetch = 0 : i64, scratch_operands = 0 : i64, tpu.core_type = #tpu.core_type<tc>, window_params = [{transform_indices = @transform_0, window_bounds = array<i64: 3, 128>}, {pipeline_mode = #tpu.pipeline_mode<synchronous>, transform_indices = @transform_1, window_bounds = array<i64: 64, 3>}, {pipeline_mode = #tpu.pipeline_mode<synchronous>, transform_indices = @transform_2, window_bounds = array<i64: 64, 1>}, {pipeline_mode = #tpu.pipeline_mode<synchronous>, transform_indices = @transform_3, window_bounds = array<i64: 128, 64>}, {pipeline_mode = #tpu.pipeline_mode<synchronous>, transform_indices = @transform_4, window_bounds = array<i64: 128, 1>}, {pipeline_mode = #tpu.pipeline_mode<synchronous>, transform_indices = @transform_5, window_bounds = array<i64: 128, 1>}]} {
    %c0_i32 = arith.constant 0 : i32
    %0 = arith.cmpi eq, %arg0, %c0_i32 : i32
    %1 = arith.extui %0 : i1 to i32
    %c0_i32_0 = arith.constant 0 : i32
    %2 = arith.cmpi ne, %1, %c0_i32_0 : i32
    scf.if %2 {
      %cst_21 = arith.constant 0.000000e+00 : f32
      %28 = vector.broadcast %cst_21 : f32 to vector<128x1xf32>
      %c0_22 = arith.constant 0 : index
      %c0_23 = arith.constant 0 : index
      %29 = vector.load %arg5[%c0_22, %c0_23] : memref<128x1xf32, #tpu.memory_space<vmem>>, vector<128x1xf32>
      tpu.vector_store %arg5[%c0_22, %c0_23], %28 {strides = array<i32>} : memref<128x1xf32, #tpu.memory_space<vmem>>, vector<128x1xf32>,
      %cst_24 = arith.constant 0.000000e+00 : f32
      %30 = vector.broadcast %cst_24 : f32 to vector<128x1xf32>
      %c0_25 = arith.constant 0 : index
      %c0_26 = arith.constant 0 : index
      %31 = vector.load %arg6[%c0_25, %c0_26] : memref<128x1xf32, #tpu.memory_space<vmem>>, vector<128x1xf32>
      tpu.vector_store %arg6[%c0_25, %c0_26], %30 {strides = array<i32>} : memref<128x1xf32, #tpu.memory_space<vmem>>, vector<128x1xf32>,
    } else {
    }
    %c0 = arith.constant 0 : index
    %c0_1 = arith.constant 0 : index
    %3 = vector.load %arg1[%c0, %c0_1] : memref<3x128xf32, #tpu.memory_space<vmem>>, vector<3x128xf32>
    %c0_2 = arith.constant 0 : index
    %c0_3 = arith.constant 0 : index
    %4 = vector.load %arg2[%c0_2, %c0_3] : memref<64x3xf32, #tpu.memory_space<vmem>>, vector<64x3xf32>
    %cst = arith.constant dense<0.000000e+00> : vector<64x128xf32>
    %5 = tpu.matmul %4, %3, %cst {dimension_numbers = #tpu.dot_dimension_numbers<[1], [0], [0], [1], [0, 0, 1, 1], [], []>} : vector<64x3xf32>, vector<3x128xf32>, vector<64x128xf32> -> vector<64x128xf32>
    %c0_4 = arith.constant 0 : index
    %c0_5 = arith.constant 0 : index
    %6 = vector.load %arg3[%c0_4, %c0_5] : memref<64x1xf32, #tpu.memory_space<vmem>>, vector<64x1xf32>
    %7 = vector.broadcast %6 : vector<64x1xf32> to vector<64x128xf32>
    %8 = arith.addf %5, %7 : vector<64x128xf32>
    %cst_6 = arith.constant 0.000000e+00 : f32
    %9 = vector.broadcast %cst_6 : f32 to vector<64x128xf32>
    %10 = arith.cmpf ogt, %8, %9 : vector<64x128xf32>
    %cst_7 = arith.constant 2.000000e-01 : f32
    %11 = vector.broadcast %cst_7 : f32 to vector<64x128xf32>
    %12 = arith.mulf %11, %8 : vector<64x128xf32>
    %13 = arith.select %10, %8, %12 : vector<64x128xi1>, vector<64x128xf32>
    %c0_8 = arith.constant 0 : index
    %c0_9 = arith.constant 0 : index
    %14 = vector.load %arg4[%c0_8, %c0_9] : memref<128x64xbf16, #tpu.memory_space<vmem>>, vector<128x64xbf16>
    %15 = arith.truncf %13 : vector<64x128xf32> to vector<64x128xbf16>
    %cst_10 = arith.constant dense<0.000000e+00> : vector<128x128xf32>
    %16 = tpu.matmul %14, %15, %cst_10 {dimension_numbers = #tpu.dot_dimension_numbers<[1], [0], [0], [1], [0, 0, 1, 1], [], []>} : vector<128x64xbf16>, vector<64x128xbf16>, vector<128x128xf32> -> vector<128x128xf32>
    %c0_11 = arith.constant 0 : index
    %c0_12 = arith.constant 0 : index
    %17 = vector.load %arg5[%c0_11, %c0_12] : memref<128x1xf32, #tpu.memory_space<vmem>>, vector<128x1xf32>
    %cst_13 = arith.constant dense<0.000000e+00> : vector<128xf32>
    %18 = vector.multi_reduction <add>, %16, %cst_13 [1] : vector<128x128xf32> to vector<128xf32>
    %19 = vector.shape_cast %18 : vector<128xf32> to vector<128x1xf32>
    %20 = arith.addf %17, %19 : vector<128x1xf32>
    %c0_14 = arith.constant 0 : index
    %c0_15 = arith.constant 0 : index
    %21 = vector.load %arg5[%c0_14, %c0_15] : memref<128x1xf32, #tpu.memory_space<vmem>>, vector<128x1xf32>
    tpu.vector_store %arg5[%c0_14, %c0_15], %20 {strides = array<i32>} : memref<128x1xf32, #tpu.memory_space<vmem>>, vector<128x1xf32>,
    %c0_16 = arith.constant 0 : index
    %c0_17 = arith.constant 0 : index
    %22 = vector.load %arg6[%c0_16, %c0_17] : memref<128x1xf32, #tpu.memory_space<vmem>>, vector<128x1xf32>
    %23 = arith.mulf %16, %16 : vector<128x128xf32>
    %cst_18 = arith.constant dense<0.000000e+00> : vector<128xf32>
    %24 = vector.multi_reduction <add>, %23, %cst_18 [1] : vector<128x128xf32> to vector<128xf32>
    %25 = vector.shape_cast %24 : vector<128xf32> to vector<128x1xf32>
    %26 = arith.addf %22, %25 : vector<128x1xf32>
    %c0_19 = arith.constant 0 : index
    %c0_20 = arith.constant 0 : index
    %27 = vector.load %arg6[%c0_19, %c0_20] : memref<128x1xf32, #tpu.memory_space<vmem>>, vector<128x1xf32>
    tpu.vector_store %arg6[%c0_19, %c0_20], %26 {strides = array<i32>} : memref<128x1xf32, #tpu.memory_space<vmem>>, vector<128x1xf32>,
    return
  }
  func.func @transform_0(%arg0: i32) -> (i32, i32) {
    %c0_i32 = arith.constant 0 : i32
    %c0_i32_0 = arith.constant 0 : i32
    return %c0_i32, %arg0 : i32, i32
  }
  func.func @transform_1(%arg0: i32) -> (i32, i32) {
    %c0_i32 = arith.constant 0 : i32
    %c0_i32_0 = arith.constant 0 : i32
    %c0_i32_1 = arith.constant 0 : i32
    return %c0_i32, %c0_i32_0 : i32, i32
  }
  func.func @transform_2(%arg0: i32) -> (i32, i32) {
    %c0_i32 = arith.constant 0 : i32
    %c0_i32_0 = arith.constant 0 : i32
    %c0_i32_1 = arith.constant 0 : i32
    return %c0_i32, %c0_i32_0 : i32, i32
  }
  func.func @transform_3(%arg0: i32) -> (i32, i32) {
    %c0_i32 = arith.constant 0 : i32
    %c0_i32_0 = arith.constant 0 : i32
    %c0_i32_1 = arith.constant 0 : i32
    return %c0_i32, %c0_i32_0 : i32, i32
  }
  func.func @transform_4(%arg0: i32) -> (i32, i32) {
    %c0_i32 = arith.constant 0 : i32
    %c0_i32_0 = arith.constant 0 : i32
    %c0_i32_1 = arith.constant 0 : i32
    return %c0_i32, %c0_i32_0 : i32, i32
  }
  func.func @transform_5(%arg0: i32) -> (i32, i32) {
    %c0_i32 = arith.constant 0 : i32
    %c0_i32_0 = arith.constant 0 : i32
    %c0_i32_1 = arith.constant 0 : i32
    return %c0_i32, %c0_i32_0 : i32, i32
  }
}

</mosaic_0001>

<bundles_post_ra>
// kernel: tpu_custom_call.1
= control target key start
LH: loop header
LB: loop body
LE: loop exit
PB: predicated region body
PF: predicated region fallthrough
CT: control target
= control target key end

     0   :  { %s1011_s18 = smov 0   ;;  %s1468_s0 = inlined_call_operand.vmem [shape: f32[3,512], index: 0, kind: input, shape index: {}]   ;;  %s1469_s1 = inlined_call_operand.vmem [shape: f32[64,3], index: 1, kind: input, shape index: {}]   ;;  %s1470_s2 = inlined_call_operand.vmem [shape: f32[64,1], index: 2, kind: input, shape index: {}]   ;;  %s1471_s3 = inlined_call_operand.vmem [shape: bf16[128,64], index: 3, kind: input, shape index: {}]   ;;  %s1472_s4 = inlined_call_operand.vmem [shape: f32[128,1], index: 4, kind: output, shape index: {0}]   ;;  %s1473_s5 = inlined_call_operand.vmem [shape: f32[128,1], index: 5, kind: output, shape index: {1}]  }
   0x1 LB: > { %s851_s19 = sadd.s32 4294967295, %s977_s18   ;;  %p854_p0 = scmp.ge.s32.totalorder %s977_s18, 1  ;;  %s977_s18 = sphi %s1011_s18, %s16_s18  }
   0x2   : > { %p179_p1 = scmp.lt.s32.totalorder %s977_s18, 5 }
   0x4   : > { %p180_p2 = pnand %p854_p0, %p179_p1 }
   0x5   : > { %p201_p3 = scmp.lt.s32.totalorder (!%p180_p2), %s851_s19, 3  ;;  %p856_p4 = scmp.ne.s32.totalorder (!%p180_p2), %s851_s19, 0 }
   0x6   : > { %183 = sbr.rel (%p180_p2) target bundleno = 691 (0x2b3), region = 36 }
   0xd   : > { %s202_s20 = scalar_select %p201_p3, %s851_s19, 3 }
   0xe   : > { %209 = sbr.rel (%p856_p4) target bundleno = 31 (0x1f), region = 40  ;;  %vm210_vm0 = vcmask (!%p856_p4), 7168   ;;  %v979_v0 = vmov (!%p856_p4), 0.0  }
   0xf   : > { %s855_s21 = sshll.u32 %s202_s20, 2  ;;  %211 = vst.msk [vmem:[%s1472_s4] sm:$0xff] (!%p856_p4), %vm210_vm0, %v979_v0  ;;  %212 = vst.msk [vmem:[%s1472_s4 + $0x8] sm:$0xff] (!%p856_p4), %vm210_vm0, %v979_v0 }
  0x10   : > { %s1022_s24 = scalar_lea.vmem %s1468_s0, %s855_s21  ;;  %213 = vst.msk [vmem:[%s1472_s4 + $0x10] sm:$0xff] (!%p856_p4), %vm210_vm0, %v979_v0  ;;  %214 = vst.msk [vmem:[%s1472_s4 + $0x18] sm:$0xff] (!%p856_p4), %vm210_vm0, %v979_v0 }
  0x11   : > { %215 = vst.msk [vmem:[%s1472_s4 + $0x20] sm:$0xff] (!%p856_p4), %vm210_vm0, %v979_v0  ;;  %216 = vst.msk [vmem:[%s1472_s4 + $0x28] sm:$0xff] (!%p856_p4), %vm210_vm0, %v979_v0 }
  0x12   : > { %217 = vst.msk [vmem:[%s1472_s4 + $0x30] sm:$0xff] (!%p856_p4), %vm210_vm0, %v979_v0  ;;  %218 = vst.msk [vmem:[%s1472_s4 + $0x38] sm:$0xff] (!%p856_p4), %vm210_vm0, %v979_v0 }
  0x13   : > { %219 = vst.msk [vmem:[%s1472_s4 + $0x40] sm:$0xff] (!%p856_p4), %vm210_vm0, %v979_v0  ;;  %220 = vst.msk [vmem:[%s1472_s4 + $0x48] sm:$0xff] (!%p856_p4), %vm210_vm0, %v979_v0 }
  0x14   : > { %221 = vst.msk [vmem:[%s1472_s4 + $0x50] sm:$0xff] (!%p856_p4), %vm210_vm0, %v979_v0  ;;  %222 = vst.msk [vmem:[%s1472_s4 + $0x58] sm:$0xff] (!%p856_p4), %vm210_vm0, %v979_v0 }
  0x15   : > { %223 = vst.msk [vmem:[%s1472_s4 + $0x60] sm:$0xff] %vm210_vm0, %v979_v0  ;;  %224 = vst.msk [vmem:[%s1472_s4 + $0x68] sm:$0xff] %vm210_vm0, %v979_v0 }
  0x16   : > { %225 = vst.msk [vmem:[%s1472_s4 + $0x70] sm:$0xff] %vm210_vm0, %v979_v0  ;;  %226 = vst.msk [vmem:[%s1472_s4 + $0x78] sm:$0xff] %vm210_vm0, %v979_v0 }
  0x17   : > { %227 = vst.msk [vmem:[%s1473_s5] sm:$0xff] %vm210_vm0, %v979_v0  ;;  %228 = vst.msk [vmem:[%s1473_s5 + $0x8] sm:$0xff] %vm210_vm0, %v979_v0 }
  0x18   : > { %229 = vst.msk [vmem:[%s1473_s5 + $0x10] sm:$0xff] %vm210_vm0, %v979_v0  ;;  %230 = vst.msk [vmem:[%s1473_s5 + $0x18] sm:$0xff] %vm210_vm0, %v979_v0 }
  0x19   : > { %231 = vst.msk [vmem:[%s1473_s5 + $0x20] sm:$0xff] %vm210_vm0, %v979_v0  ;;  %232 = vst.msk [vmem:[%s1473_s5 + $0x28] sm:$0xff] %vm210_vm0, %v979_v0 }
  0x1a   : > { %233 = vst.msk [vmem:[%s1473_s5 + $0x30] sm:$0xff] %vm210_vm0, %v979_v0  ;;  %234 = vst.msk [vmem:[%s1473_s5 + $0x38] sm:$0xff] %vm210_vm0, %v979_v0 }
  0x1b   : > { %235 = vst.msk [vmem:[%s1473_s5 + $0x40] sm:$0xff] %vm210_vm0, %v979_v0  ;;  %236 = vst.msk [vmem:[%s1473_s5 + $0x48] sm:$0xff] %vm210_vm0, %v979_v0 }
  0x1c   : > { %237 = vst.msk [vmem:[%s1473_s5 + $0x50] sm:$0xff] %vm210_vm0, %v979_v0  ;;  %238 = vst.msk [vmem:[%s1473_s5 + $0x58] sm:$0xff] %vm210_vm0, %v979_v0 }
  0x1d   : > { %239 = vst.msk [vmem:[%s1473_s5 + $0x60] sm:$0xff] %vm210_vm0, %v979_v0  ;;  %240 = vst.msk [vmem:[%s1473_s5 + $0x68] sm:$0xff] %vm210_vm0, %v979_v0 }
  0x1e   : > { %241 = vst.msk [vmem:[%s1473_s5 + $0x70] sm:$0xff] %vm210_vm0, %v979_v0  ;;  %242 = vst.msk [vmem:[%s1473_s5 + $0x78] sm:$0xff] %vm210_vm0, %v979_v0 }
  0x1f PF: > { %v243_v1 = vld [vmem:[%s1022_s24] sm:$0x7]  ;;  %vm325_vm1 = vcmask 1042432   ;;  %vm300_vm2 = vcmask 23552   ;;  %v245_v3 = vld [vmem:[%s1469_s1 + $0x8] sm:$0xff]  ;;  %v246_v4 = vld [vmem:[%s1469_s1 + $0x10] sm:$0xff] }
  0x20   : > { %v244_v2 = vld [vmem:[%s1469_s1] sm:$0xff]  ;;  %905 = vmatprep.subr.msk.mxu0 %vm325_vm1, %v243_v1  ;;  %v980_v5 = vmov 0   ;;  %v254_v7 = vld [vmem:[%s1470_s2 + $0x10] sm:$0xff]  ;;  %v247_v8 = vld [vmem:[%s1469_s1 + $0x18] sm:$0xff]  ;;  %vm518_vm3 = vcmask 523264   ;;  %vm704_vm12 = vcmask 7168  }
  0x21   : > { %907 = vmatprep.mubr.msk.f32.mxu0 %vm300_vm2, %v244_v2  ;;  %906 = vmatpush3.msk.msra.mxu0 %vm325_vm1, %v243_v1  ;;  %v252_v6 = vld [vmem:[%s1470_s2] sm:$0xff]  ;;  %v253_v10 = vld [vmem:[%s1470_s2 + $0x8] sm:$0xff]  ;;  %v255_v11 = vld [vmem:[%s1470_s2 + $0x18] sm:$0xff] }
  0x22   : > { %961 = vset.pattern.permute.xlu0 %v980_v5  ;;  %908 = vmatmul.mubr.msk.f32.vlgmr.msra.gmra.mrb[0].mxu0 %vm300_vm2, %v245_v3  ;;  %v248_v9 = vld [vmem:[%s1469_s1 + $0x20] sm:$0xff]  ;;  %v249_v12 = vld [vmem:[%s1469_s1 + $0x28] sm:$0xff]  ;;  %v250_v13 = vld [vmem:[%s1469_s1 + $0x30] sm:$0xff] }
  0x23   : > { %962 = vset.pattern.permute.xlu1 %v980_v5  ;;  %910 = vmatprep.mubr.msk.f32.mxu0 %vm300_vm2, %v246_v4  ;;  %v256_v14 = vld [vmem:[%s1470_s2 + $0x20] sm:$0xff]  ;;  %v257_v15 = vld [vmem:[%s1470_s2 + $0x28] sm:$0xff]  ;;  %v251_v16 = vld [vmem:[%s1469_s1 + $0x38] sm:$0xff] }
  0x24   : > { %262 = vperm.xlu0 %961, %v252_v6   ;;  %272 = vperm.xlu1 %962, %v254_v7   ;;  %v258_v17 = vld [vmem:[%s1470_s2 + $0x30] sm:$0xff]  ;;  %v259_v18 = vld [vmem:[%s1470_s2 + $0x38] sm:$0xff]  ;;  %v963_v19 = vld [vmem:[%s1471_s3] sm:$0xff]  }
  0x25   : > { %v964_v20 = vld [vmem:[%s1471_s3 + $0x10] sm:$0xff]   ;;  %v965_v1 = vld [vmem:[%s1471_s3 + $0x8] sm:$0xff]   ;;  %v966_v2 = vld [vmem:[%s1471_s3 + $0x18] sm:$0xff]  }
  0x26   : > { %911 = vmatmul.mubr.msk.f32.gmra.mrb[2].mxu0 %vm300_vm2, %v247_v8  ;;  %931 = vmatprep.mubr.msk.bf16.mxu1 %vm518_vm3, %v964_v20  ;;  %v967_v3 = vld [vmem:[%s1471_s3 + $0x20] sm:$0xff]   ;;  %v968_v4 = vld [vmem:[%s1471_s3 + $0x28] sm:$0xff]   ;;  %v969_v5 = vld [vmem:[%s1471_s3 + $0x30] sm:$0xff]  }
  0x27   : > { %913 = vmatprep.mubr.msk.f32.mxu0 %vm300_vm2, %v248_v9  ;;  %v970_v6 = vld [vmem:[%s1471_s3 + $0x38] sm:$0xff]  }
  0x28   : > { %267 = vperm.xlu0 %961, %v253_v10   ;;  %277 = vperm.xlu1 %962, %v255_v11  }
  0x2a   : > { %914 = vmatmul.mubr.msk.f32.gmra.mrb[4].mxu0 %vm300_vm2, %v249_v12 }
  0x2b   : > { %916 = vmatprep.mubr.msk.f32.mxu0 %vm300_vm2, %v250_v13 }
  0x2c   : > { %282 = vperm.xlu0 %961, %v256_v14   ;;  %287 = vperm.xlu1 %962, %v257_v15  }
  0x2e   : > { %917 = vmatmul.mubr.msk.f32.gmra.mrb[6].mxu0 %vm300_vm2, %v251_v16 }
  0x2f   : > { %927 = vmatprep.mubr.msk.bf16.mxu0 %vm518_vm3, %v963_v19 }
  0x30   : > { %292 = vperm.xlu0 %961, %v258_v17   ;;  %297 = vperm.xlu1 %962, %v259_v18  }
  0xa3   : > { %v263_v21 = vpop.permute.xlu0 %262  ;;  %v273_v22 = vpop.permute.xlu1 %272 }
  0xa7   : > { %v268_v23 = vpop.permute.xlu0 %267  ;;  %v278_v24 = vpop.permute.xlu1 %277 }
  0xab   : > { %v288_v35 = vpop.permute.xlu1 %287  ;;  %v283_v38 = vpop.permute.xlu0 %282 }
  0xaf   : > { %v298_v50 = vpop.permute.xlu1 %297  ;;  %v293_v53 = vpop.permute.xlu0 %292 }
  0xf5   : > { %v909_v25 = vpop.f32.mrb[0].mxu0 }
  0xf6   : > { %v401_v26 = vadd.f32 %v909_v25, %v268_v23  ;;  %v395_v27 = vpop.f32.mrb[1].mxu0 }
  0xf7   : > { %v396_v28 = vadd.f32 %v395_v27, %v263_v21 }
  0xf8   : > { %vm435_vm4 = vcmp.gt.f32.partialorder %v401_v26, 0.0  ;;  %v443_v29 = vmul.f32 0.2, %v401_v26 }
  0xf9   : > { %vm434_vm5 = vcmp.gt.f32.partialorder %v396_v28, 0.0  ;;  %v442_v30 = vmul.f32 0.2, %v396_v28  ;;  %v912_v31 = vpop.f32.mrb[2].mxu0 }
  0xfa   : > { %v451_v32 = vsel %vm435_vm4, %v401_v26, %v443_v29  ;;  %v411_v33 = vadd.f32 %v912_v31, %v278_v24  ;;  %v405_v34 = vpop.f32.mrb[3].mxu0 }
  0xfb   : > { %v450_v36 = vsel %vm434_vm5, %v396_v28, %v442_v30  ;;  %v406_v37 = vadd.f32 %v405_v34, %v273_v22 }
  0xfc   : > { %v474_v39 = vpack.c.bf16 %v451_v32, %v450_v36  ;;  %vm437_vm6 = vcmp.gt.f32.partialorder %v411_v33, 0.0  ;;  %v445_v40 = vmul.f32 0.2, %v411_v33 }
  0xfd   : > { %vm436_vm7 = vcmp.gt.f32.partialorder %v406_v37, 0.0  ;;  %v444_v41 = vmul.f32 0.2, %v406_v37  ;;  %v915_v42 = vpop.f32.mrb[4].mxu0 }
  0xfe   : > { %v453_v43 = vsel %vm437_vm6, %v411_v33, %v445_v40  ;;  %v421_v44 = vadd.f32 %v915_v42, %v288_v35  ;;  %v415_v45 = vpop.f32.mrb[5].mxu0  ;;  %919 = vmatprep.subr.bf16.mxu0 %v474_v39  ;;  %943 = vmatprep.subr.bf16.mxu1 %v474_v39  ;;  %v642_v40 = vld [vmem:[%s1472_s4 + $0x10] sm:$0xff] }
  0xff   : > { %v452_v46 = vsel %vm436_vm7, %v406_v37, %v444_v41  ;;  %v416_v47 = vadd.f32 %v415_v45, %v283_v38  ;;  %920 = vmatpush3.bf16.msra.mxu0 %v474_v39  ;;  %947 = vmatpush3.bf16.msra.mxu1 %v474_v39  ;;  %v646_v39 = vld [vmem:[%s1472_s4 + $0x30] sm:$0xff]  ;;  %v644_v45 = vld [vmem:[%s1472_s4 + $0x20] sm:$0xff] }
 0x100   : > { %v475_v48 = vpack.c.bf16 %v453_v43, %v452_v46  ;;  %vm439_vm8 = vcmp.gt.f32.partialorder %v421_v44, 0.0  ;;  %v447_v49 = vmul.f32 0.2, %v421_v44  ;;  %v640_v46 = vld [vmem:[%s1472_s4] sm:$0xff] }
 0x101   : > { %vm438_vm9 = vcmp.gt.f32.partialorder %v416_v47, 0.0  ;;  %v446_v51 = vmul.f32 0.2, %v416_v47  ;;  %v918_v52 = vpop.f32.mrb[6].mxu0 }
 0x102   : > { %v455_v54 = vsel %vm439_vm8, %v421_v44, %v447_v49  ;;  %v431_v55 = vadd.f32 %v918_v52, %v298_v50  ;;  %v425_v56 = vpop.f32.mrb[7].mxu0  ;;  %921 = vmatprep.subr.bf16.mxu0 %v475_v48  ;;  %944 = vmatprep.subr.bf16.mxu1 %v475_v48  ;;  %v643_v52 = vld [vmem:[%s1472_s4 + $0x18] sm:$0xff] }
 0x103   : > { %v454_v57 = vsel %vm438_vm9, %v416_v47, %v446_v51  ;;  %v426_v58 = vadd.f32 %v425_v56, %v293_v53  ;;  %922 = vmatpush3.bf16.msra.mxu0 %v475_v48  ;;  %948 = vmatpush3.bf16.msra.mxu1 %v475_v48  ;;  %v723_v51 = vld [vmem:[%s1473_s5 + $0x10] sm:$0xff] }
 0x104   : > { %v476_v59 = vpack.c.bf16 %v455_v54, %v454_v57  ;;  %vm441_vm10 = vcmp.gt.f32.partialorder %v431_v55, 0.0  ;;  %v449_v60 = vmul.f32 0.2, %v431_v55  ;;  %v727_v57 = vld [vmem:[%s1473_s5 + $0x30] sm:$0xff] }
 0x105   : > { %vm440_vm11 = vcmp.gt.f32.partialorder %v426_v58, 0.0  ;;  %v448_v61 = vmul.f32 0.2, %v426_v58 }
 0x106   : > { %v457_v62 = vsel %vm441_vm10, %v431_v55, %v449_v60  ;;  %923 = vmatprep.subr.bf16.mxu0 %v476_v59  ;;  %945 = vmatprep.subr.bf16.mxu1 %v476_v59 }
 0x107   : > { %v456_v63 = vsel %vm440_vm11, %v426_v58, %v448_v61  ;;  %924 = vmatpush3.bf16.msra.mxu0 %v476_v59  ;;  %949 = vmatpush3.bf16.msra.mxu1 %v476_v59  ;;  %v647_v58 = vld [vmem:[%s1472_s4 + $0x38] sm:$0xff] }
 0x108   : > { %v477_v0 = vpack.c.bf16 %v457_v62, %v456_v63  ;;  %v645_v63 = vld [vmem:[%s1472_s4 + $0x28] sm:$0xff] }
 0x10a   : > { %925 = vmatprep.subr.bf16.mxu0 %v477_v0  ;;  %946 = vmatprep.subr.bf16.mxu1 %v477_v0 }
 0x10b   : > { %926 = vmatpush3.bf16.msra.mxu0 %v477_v0  ;;  %950 = vmatpush3.bf16.msra.mxu1 %v477_v0  ;;  %v641_v0 = vld [vmem:[%s1472_s4 + $0x8] sm:$0xff] }
 0x10e   : > { %928 = vmatmul.mubr.msk.bf16.vlgmr.msra.gmra.mrb[8].mxu0 %vm518_vm3, %v965_v1  ;;  %932 = vmatmul.mubr.msk.bf16.vlgmr.msra.gmra.mrb[0].mxu1 %vm518_vm3, %v966_v2 }
 0x10f   : > { %935 = vmatprep.mubr.msk.bf16.mxu1 %vm518_vm3, %v967_v3 }
 0x116   : > { %936 = vmatmul.mubr.msk.bf16.gmra.mrb[4].mxu1 %vm518_vm3, %v968_v4 }
 0x117   : > { %939 = vmatprep.mubr.msk.bf16.mxu1 %vm518_vm3, %v969_v5  ;;  %v724_v5 = vld [vmem:[%s1473_s5 + $0x18] sm:$0xff] }
 0x11e   : > { %940 = vmatmul.mubr.msk.bf16.gmra.mrb[8].mxu1 %vm518_vm3, %v970_v6  ;;  %v721_v6 = vld [vmem:[%s1473_s5] sm:$0xff] }
 0x1e1   : > { %v929_v7 = vpop.f32.mrb[8].mxu0  ;;  %v933_v8 = vpop.f32.mrb[0].mxu1 }
 0x1e2   : > { %668 = vadd.xlane.f32.xlu1 %v933_v8  ;;  %660 = vadd.xlane.f32.xlu0 %v929_v7  ;;  %v577_v9 = vpop.f32.mrb[9].mxu0  ;;  %v593_v10 = vpop.f32.mrb[1].mxu1  ;;  %v739_v15 = vmul.f32 %v929_v7, %v929_v7  ;;  %v743_v19 = vmul.f32 %v933_v8, %v933_v8 }
 0x1e3   : > { %v930_v11 = vpop.f32.mrb[10].mxu0  ;;  %v934_v12 = vpop.f32.mrb[2].mxu1  ;;  %v737_v25 = vmul.f32 %v577_v9, %v577_v9  ;;  %v741_v28 = vmul.f32 %v593_v10, %v593_v10 }
 0x1e4   : > { %v580_v13 = vpop.f32.mrb[11].mxu0  ;;  %v596_v14 = vpop.f32.mrb[3].mxu1  ;;  %v740_v24 = vmul.f32 %v930_v11, %v930_v11  ;;  %v744_v27 = vmul.f32 %v934_v12, %v934_v12 }
 0x1e5   : > { %v738_v29 = vmul.f32 %v580_v13, %v580_v13  ;;  %v742_v30 = vmul.f32 %v596_v14, %v596_v14 }
 0x1e6   : > { %664 = vadd.xlane.f32.xlu1 %v593_v10  ;;  %656 = vadd.xlane.f32.xlu0 %v577_v9 }
 0x1e9   : > { %v937_v16 = vpop.f32.mrb[4].mxu1 }
 0x1ea   : > { %757 = vadd.xlane.f32.xlu1 %v739_v15  ;;  %662 = vadd.xlane.f32.xlu0 %v930_v11  ;;  %v609_v17 = vpop.f32.mrb[5].mxu1  ;;  %v747_v31 = vmul.f32 %v937_v16, %v937_v16  ;;  %v728_v11 = vld [vmem:[%s1473_s5 + $0x38] sm:$0xff] }
 0x1eb   : > { %v938_v18 = vpop.f32.mrb[6].mxu1  ;;  %v745_v32 = vmul.f32 %v609_v17, %v609_v17 }
 0x1ec   : > { %v612_v20 = vpop.f32.mrb[7].mxu1  ;;  %v748_v33 = vmul.f32 %v938_v18, %v938_v18 }
 0x1ed   : > { %v746_v34 = vmul.f32 %v612_v20, %v612_v20 }
 0x1ee   : > { %765 = vadd.xlane.f32.xlu1 %v743_v19  ;;  %670 = vadd.xlane.f32.xlu0 %v934_v12  ;;  %v725_v12 = vld [vmem:[%s1473_s5 + $0x20] sm:$0xff] }
 0x1f1   : > { %v941_v21 = vpop.f32.mrb[8].mxu1 }
 0x1f2   : > { %666 = vadd.xlane.f32.xlu0 %v596_v14  ;;  %658 = vadd.xlane.f32.xlu1 %v580_v13  ;;  %v625_v22 = vpop.f32.mrb[9].mxu1  ;;  %v751_v36 = vmul.f32 %v941_v21, %v941_v21 }
 0x1f3   : > { %v942_v23 = vpop.f32.mrb[10].mxu1  ;;  %v749_v35 = vmul.f32 %v625_v22, %v625_v22 }
 0x1f4   : > { %v628_v26 = vpop.f32.mrb[11].mxu1  ;;  %v752_v38 = vmul.f32 %v942_v23, %v942_v23 }
 0x1f5   : > { %v750_v37 = vmul.f32 %v628_v26, %v628_v26 }
 0x1f6   : > { %759 = vadd.xlane.f32.xlu0 %v740_v24  ;;  %753 = vadd.xlane.f32.xlu1 %v737_v25  ;;  %v726_v24 = vld [vmem:[%s1473_s5 + $0x28] sm:$0xff] }
 0x1fa   : > { %767 = vadd.xlane.f32.xlu0 %v744_v27  ;;  %761 = vadd.xlane.f32.xlu1 %v741_v28 }
 0x1fe   : > { %676 = vadd.xlane.f32.xlu1 %v937_v16  ;;  %755 = vadd.xlane.f32.xlu0 %v738_v29  ;;  %v731_v29 = vld [vmem:[%s1473_s5 + $0x50] sm:$0xff] }
 0x202   : > { %672 = vadd.xlane.f32.xlu1 %v609_v17  ;;  %763 = vadd.xlane.f32.xlu0 %v742_v30  ;;  %v650_v17 = vld [vmem:[%s1472_s4 + $0x50] sm:$0xff]  ;;  %v651_v30 = vld [vmem:[%s1472_s4 + $0x58] sm:$0xff] }
 0x206   : > { %773 = vadd.xlane.f32.xlu1 %v747_v31  ;;  %678 = vadd.xlane.f32.xlu0 %v938_v18  ;;  %v722_v18 = vld [vmem:[%s1473_s5 + $0x8] sm:$0xff] }
 0x20a   : > { %769 = vadd.xlane.f32.xlu1 %v745_v32  ;;  %674 = vadd.xlane.f32.xlu0 %v612_v20 }
 0x20e   : > { %684 = vadd.xlane.f32.xlu1 %v941_v21  ;;  %775 = vadd.xlane.f32.xlu0 %v748_v33 }
 0x212   : > { %680 = vadd.xlane.f32.xlu1 %v625_v22  ;;  %771 = vadd.xlane.f32.xlu0 %v746_v34 }
 0x216   : > { %777 = vadd.xlane.f32.xlu1 %v749_v35  ;;  %686 = vadd.xlane.f32.xlu0 %v942_v23  ;;  %v648_v23 = vld [vmem:[%s1472_s4 + $0x40] sm:$0xff] }
 0x217   : > { %v729_v35 = vld [vmem:[%s1473_s5 + $0x40] sm:$0xff] }
 0x21a   : > { %781 = vadd.xlane.f32.xlu1 %v751_v36  ;;  %682 = vadd.xlane.f32.xlu0 %v628_v26  ;;  %v649_v36 = vld [vmem:[%s1472_s4 + $0x48] sm:$0xff] }
 0x21e   : > { %779 = vadd.xlane.f32.xlu0 %v750_v37 }
 0x222   : > { %783 = vadd.xlane.f32.xlu0 %v752_v38 }
 0x26f   : > { %v669_v41 = vpop.xlane.xlu1 %668  ;;  %v661_v42 = vpop.xlane.xlu0 %660 }
 0x270   : > { %v694_v43 = vadd.f32 %v669_v41, %v646_v39  ;;  %v690_v44 = vadd.f32 %v661_v42, %v642_v40  ;;  %v654_v41 = vld [vmem:[%s1472_s4 + $0x70] sm:$0xff]  ;;  %v732_v42 = vld [vmem:[%s1473_s5 + $0x58] sm:$0xff] }
 0x272   : > { %711 = vst.msk [vmem:[%s1472_s4 + $0x30] sm:$0xff] %vm704_vm12, %v694_v43  ;;  %707 = vst.msk [vmem:[%s1472_s4 + $0x10] sm:$0xff] %vm704_vm12, %v690_v44 }
 0x273   : > { %v665_v47 = vpop.xlane.xlu1 %664  ;;  %v657_v48 = vpop.xlane.xlu0 %656 }
 0x274   : > { %v692_v49 = vadd.f32 %v665_v47, %v644_v45  ;;  %v688_v50 = vadd.f32 %v657_v48, %v640_v46  ;;  %v652_v47 = vld [vmem:[%s1472_s4 + $0x60] sm:$0xff]  ;;  %v730_v48 = vld [vmem:[%s1473_s5 + $0x48] sm:$0xff] }
 0x276   : > { %709 = vst.msk [vmem:[%s1472_s4 + $0x20] sm:$0xff] %vm704_vm12, %v692_v49  ;;  %705 = vst.msk [vmem:[%s1472_s4] sm:$0xff] %vm704_vm12, %v688_v50 }
 0x277   : > { %v758_v53 = vpop.xlane.xlu1 %757  ;;  %v663_v54 = vpop.xlane.xlu0 %662 }
 0x278   : > { %v787_v55 = vadd.f32 %v758_v53, %v723_v51  ;;  %v691_v56 = vadd.f32 %v663_v54, %v643_v52  ;;  %v733_v53 = vld [vmem:[%s1473_s5 + $0x60] sm:$0xff]  ;;  %v655_v54 = vld [vmem:[%s1472_s4 + $0x78] sm:$0xff] }
 0x27a   : > { %803 = vst.msk [vmem:[%s1473_s5 + $0x10] sm:$0xff] %vm704_vm12, %v787_v55  ;;  %708 = vst.msk [vmem:[%s1472_s4 + $0x18] sm:$0xff] %vm704_vm12, %v691_v56 }
 0x27b   : > { %v766_v59 = vpop.xlane.xlu1 %765  ;;  %v671_v60 = vpop.xlane.xlu0 %670 }
 0x27c   : > { %v791_v61 = vadd.f32 %v766_v59, %v727_v57  ;;  %v695_v62 = vadd.f32 %v671_v60, %v647_v58  ;;  %v735_v59 = vld [vmem:[%s1473_s5 + $0x70] sm:$0xff]  ;;  %v653_v60 = vld [vmem:[%s1472_s4 + $0x68] sm:$0xff] }
 0x27e   : > { %807 = vst.msk [vmem:[%s1473_s5 + $0x30] sm:$0xff] %vm704_vm12, %v791_v61  ;;  %712 = vst.msk [vmem:[%s1472_s4 + $0x38] sm:$0xff] %vm704_vm12, %v695_v62 }
 0x27f   : > { %v667_v1 = vpop.xlane.xlu0 %666  ;;  %v659_v2 = vpop.xlane.xlu1 %658 }
 0x280   : > { %v693_v3 = vadd.f32 %v667_v1, %v645_v63  ;;  %v689_v4 = vadd.f32 %v659_v2, %v641_v0  ;;  %v734_v1 = vld [vmem:[%s1473_s5 + $0x68] sm:$0xff] }
 0x282   : > { %710 = vst.msk [vmem:[%s1472_s4 + $0x28] sm:$0xff] %vm704_vm12, %v693_v3  ;;  %706 = vst.msk [vmem:[%s1472_s4 + $0x8] sm:$0xff] %vm704_vm12, %v689_v4  ;;  %v736_v4 = vld [vmem:[%s1473_s5 + $0x78] sm:$0xff] }
 0x283   : > { %v760_v7 = vpop.xlane.xlu0 %759  ;;  %v754_v8 = vpop.xlane.xlu1 %753 }
 0x284   : > { %v788_v9 = vadd.f32 %v760_v7, %v724_v5  ;;  %v785_v10 = vadd.f32 %v754_v8, %v721_v6 }
 0x286   : > { %804 = vst.msk [vmem:[%s1473_s5 + $0x18] sm:$0xff] %vm704_vm12, %v788_v9  ;;  %801 = vst.msk [vmem:[%s1473_s5] sm:$0xff] %vm704_vm12, %v785_v10 }
 0x287   : > { %v768_v13 = vpop.xlane.xlu0 %767  ;;  %v762_v14 = vpop.xlane.xlu1 %761 }
 0x288   : > { %v792_v15 = vadd.f32 %v768_v13, %v728_v11  ;;  %v789_v16 = vadd.f32 %v762_v14, %v725_v12 }
 0x28a   : > { %808 = vst.msk [vmem:[%s1473_s5 + $0x38] sm:$0xff] %vm704_vm12, %v792_v15  ;;  %805 = vst.msk [vmem:[%s1473_s5 + $0x20] sm:$0xff] %vm704_vm12, %v789_v16 }
 0x28b   : > { %v677_v19 = vpop.xlane.xlu1 %676  ;;  %v756_v20 = vpop.xlane.xlu0 %755 }
 0x28c   : > { %v698_v21 = vadd.f32 %v677_v19, %v650_v17  ;;  %v786_v22 = vadd.f32 %v756_v20, %v722_v18 }
 0x28e   : > { %715 = vst.msk [vmem:[%s1472_s4 + $0x50] sm:$0xff] %vm704_vm12, %v698_v21  ;;  %802 = vst.msk [vmem:[%s1473_s5 + $0x8] sm:$0xff] %vm704_vm12, %v786_v22 }
 0x28f   : > { %v673_v25 = vpop.xlane.xlu1 %672  ;;  %v764_v26 = vpop.xlane.xlu0 %763 }
 0x290   : > { %v696_v27 = vadd.f32 %v673_v25, %v648_v23  ;;  %v790_v28 = vadd.f32 %v764_v26, %v726_v24 }
 0x292   : > { %713 = vst.msk [vmem:[%s1472_s4 + $0x40] sm:$0xff] %vm704_vm12, %v696_v27  ;;  %806 = vst.msk [vmem:[%s1473_s5 + $0x28] sm:$0xff] %vm704_vm12, %v790_v28 }
 0x293   : > { %v774_v31 = vpop.xlane.xlu1 %773  ;;  %v679_v32 = vpop.xlane.xlu0 %678 }
 0x294   : > { %v795_v33 = vadd.f32 %v774_v31, %v731_v29  ;;  %v699_v34 = vadd.f32 %v679_v32, %v651_v30 }
 0x296   : > { %811 = vst.msk [vmem:[%s1473_s5 + $0x50] sm:$0xff] %vm704_vm12, %v795_v33  ;;  %716 = vst.msk [vmem:[%s1472_s4 + $0x58] sm:$0xff] %vm704_vm12, %v699_v34 }
 0x297   : > { %v770_v37 = vpop.xlane.xlu1 %769  ;;  %v675_v38 = vpop.xlane.xlu0 %674 }
 0x298   : > { %v793_v39 = vadd.f32 %v770_v37, %v729_v35  ;;  %v697_v40 = vadd.f32 %v675_v38, %v649_v36 }
 0x29a   : > { %809 = vst.msk [vmem:[%s1473_s5 + $0x40] sm:$0xff] %vm704_vm12, %v793_v39  ;;  %714 = vst.msk [vmem:[%s1472_s4 + $0x48] sm:$0xff] %vm704_vm12, %v697_v40 }
 0x29b   : > { %v685_v43 = vpop.xlane.xlu1 %684  ;;  %v776_v44 = vpop.xlane.xlu0 %775 }
 0x29c   : > { %v702_v45 = vadd.f32 %v685_v43, %v654_v41  ;;  %v796_v46 = vadd.f32 %v776_v44, %v732_v42 }
 0x29e   : > { %719 = vst.msk [vmem:[%s1472_s4 + $0x70] sm:$0xff] %vm704_vm12, %v702_v45  ;;  %812 = vst.msk [vmem:[%s1473_s5 + $0x58] sm:$0xff] %vm704_vm12, %v796_v46 }
 0x29f   : > { %v681_v49 = vpop.xlane.xlu1 %680  ;;  %v772_v50 = vpop.xlane.xlu0 %771 }
 0x2a0   : > { %v700_v51 = vadd.f32 %v681_v49, %v652_v47  ;;  %v794_v52 = vadd.f32 %v772_v50, %v730_v48 }
 0x2a2   : > { %717 = vst.msk [vmem:[%s1472_s4 + $0x60] sm:$0xff] %vm704_vm12, %v700_v51  ;;  %810 = vst.msk [vmem:[%s1473_s5 + $0x48] sm:$0xff] %vm704_vm12, %v794_v52 }
 0x2a3   : > { %v778_v55 = vpop.xlane.xlu1 %777  ;;  %v687_v56 = vpop.xlane.xlu0 %686 }
 0x2a4   : > { %v797_v57 = vadd.f32 %v778_v55, %v733_v53  ;;  %v703_v58 = vadd.f32 %v687_v56, %v655_v54 }
 0x2a6   : > { %813 = vst.msk [vmem:[%s1473_s5 + $0x60] sm:$0xff] %vm704_vm12, %v797_v57  ;;  %720 = vst.msk [vmem:[%s1472_s4 + $0x78] sm:$0xff] %vm704_vm12, %v703_v58 }
 0x2a7   : > { %v782_v61 = vpop.xlane.xlu1 %781  ;;  %v683_v62 = vpop.xlane.xlu0 %682 }
 0x2a8   : > { %v799_v63 = vadd.f32 %v782_v61, %v735_v59  ;;  %v701_v0 = vadd.f32 %v683_v62, %v653_v60 }
 0x2aa   : > { %815 = vst.msk [vmem:[%s1473_s5 + $0x70] sm:$0xff] %vm704_vm12, %v799_v63  ;;  %718 = vst.msk [vmem:[%s1472_s4 + $0x68] sm:$0xff] %vm704_vm12, %v701_v0 }
 0x2ab   : > { %v780_v2 = vpop.xlane.xlu0 %779 }
 0x2ac   : > { %v798_v3 = vadd.f32 %v780_v2, %v734_v1 }
 0x2ae   : > { %814 = vst.msk [vmem:[%s1473_s5 + $0x68] sm:$0xff] %vm704_vm12, %v798_v3 }
 0x2af   : > { %v784_v5 = vpop.xlane.xlu0 %783 }
 0x2b0   : > { %v800_v6 = vadd.f32 %v784_v5, %v736_v4 }
 0x2b2   : > { %816 = vst.msk [vmem:[%s1473_s5 + $0x78] sm:$0xff] %vm704_vm12, %v800_v6 }
 0x2b3 PF: > { %s16_s18 = sadd.s32 1, %s977_s18  }
 0x2b4   : > { %p13_p5 = scmp.ge.s32.totalorder %s16_s18, 6  }
 0x2b6   :  { %15 = sbr.rel (!%p13_p5) target bundleno = 1 (0x1), region = 74 }

</bundles_post_ra>
